<compile_context>
chip_gen: v5e
topology: v5e:2x2
jax: 0.10.0
libtpu: 0.0.40
codegen_flags: <defaults>
</compile_context>

<pallas_src>
import functools

import jax
import jax.numpy as jnp
from jax.experimental import pallas as pl
from jax.experimental.pallas import tpu as pltpu


def _mlp4_kernel(x_ref,
                 w1_ref, b1_ref,
                 w2_ref, b2_ref,
                 w3_ref, b3_ref,
                 w4_ref, b4_ref,
                 o_ref):
    """Whole 4-layer MLP for one batch tile, fully resident in VMEM.

    x/weights arrive in bf16 (MXU-native); accumulation, bias add and ReLU are
    done in f32. Dropout layers are identity (eval mode)."""
    x = x_ref[...]                                   # bf16 [tile, F]

    # fc1 + relu   (dropout1 == identity in eval mode)
    h = jnp.dot(x, w1_ref[...], preferred_element_type=jnp.float32) + b1_ref[...]
    h = jnp.maximum(h, 0.0)

    # fc2 + relu   (dropout2 == identity in eval mode)
    h = jnp.dot(h.astype(w2_ref.dtype), w2_ref[...],
                preferred_element_type=jnp.float32) + b2_ref[...]
    h = jnp.maximum(h, 0.0)

    # fc3 + relu   (dropout3 == identity in eval mode)
    h = jnp.dot(h.astype(w3_ref.dtype), w3_ref[...],
                preferred_element_type=jnp.float32) + b3_ref[...]
    h = jnp.maximum(h, 0.0)

    # fc4 (logits; forward applies no sigmoid)
    # TODO(synk): output is lane-narrow (n_classes=4 << 128 lanes) -> masked
    # vst stores; if the writeback ever shows in a profile, pack n_classes of
    # several batch rows into one 128-lane row here and un-reshape in the
    # wrapper (do NOT pad n_classes to 128 in HBM).
    o_ref[...] = (jnp.dot(h.astype(w4_ref.dtype), w4_ref[...],
                          preferred_element_type=jnp.float32)
                  + b4_ref[...]).astype(o_ref.dtype)


def prepare_params(params, compute_dtype=jnp.bfloat16):
    """One-time layout/dtype prep (do this once, outside the hot path):
    torch-style (out, in) weights -> (in, out) bf16; biases -> (1, out) f32."""
    prepped = {}
    for name, (w, b) in params.items():
        prepped[name] = (
            jnp.asarray(w.T, dtype=compute_dtype),
            jnp.asarray(b, dtype=jnp.float32).reshape(1, -1),
        )
    return prepped


@functools.partial(jax.jit, static_argnames=("batch_tile",))
def mlp4_forward(x, prepped, *, batch_tile=512):
    """x: [B, F] float32.  prepped: output of prepare_params (weights already
    (in, out) bf16, biases (1, out) f32)."""
    B, F = x.shape
    w1t, b1r = prepped["fc1"]
    w2t, b2r = prepped["fc2"]
    w3t, b3r = prepped["fc3"]
    w4t, b4r = prepped["fc4"]

    h1, h2, h3 = w1t.shape[1], w2t.shape[1], w3t.shape[1]
    n_classes = w4t.shape[1]

    # Pick the batch tile: big enough to amortize per-step overhead, but try
    # to keep >=2 grid steps (v7x has 2 TensorCores sharing the batch axis).
    if B <= batch_tile:
        half = B // 2
        tile = half if (B > 8 and half % 8 == 0) else B
    else:
        tile = batch_tile          # multiple of 8 (sublane aligned)
    grid = (pl.cdiv(B, tile),)

    x_in = x.astype(w1t.dtype)     # bf16 into the first matmul (halves HBM read)

    def x_map(i):
        return (i, 0)

    def full_map(i):
        return (0, 0)

    flops = 2 * B * (F * h1 + h1 * h2 + h2 * h3 + h3 * n_classes)
    bytes_accessed = int(
        x_in.size * x_in.dtype.itemsize
        + sum(int(w.size) * w.dtype.itemsize + int(b.size) * b.dtype.itemsize
              for w, b in (prepped["fc1"], prepped["fc2"],
                           prepped["fc3"], prepped["fc4"]))
        + B * n_classes * 4
    )

    out = pl.pallas_call(
        _mlp4_kernel,
        out_shape=jax.ShapeDtypeStruct((B, n_classes), jnp.float32),
        grid_spec=pltpu.PrefetchScalarGridSpec(
            num_scalar_prefetch=0,
            grid=grid,
            in_specs=[
                pl.BlockSpec((tile, F), x_map),
                pl.BlockSpec(w1t.shape, full_map),
                pl.BlockSpec(b1r.shape, full_map),
                pl.BlockSpec(w2t.shape, full_map),
                pl.BlockSpec(b2r.shape, full_map),
                pl.BlockSpec(w3t.shape, full_map),
                pl.BlockSpec(b3r.shape, full_map),
                pl.BlockSpec(w4t.shape, full_map),
                pl.BlockSpec(b4r.shape, full_map),
            ],
            out_specs=pl.BlockSpec((tile, n_classes), x_map),
        ),
        compiler_params=pltpu.CompilerParams(
            dimension_semantics=("parallel",)),
        cost_estimate=pl.CostEstimate(flops=flops,
                                      transcendentals=0,
                                      bytes_accessed=bytes_accessed),
    )(x_in, w1t, b1r, w2t, b2r, w3t, b3r, w4t, b4r)
    return out


def init_params(key, feature_num, n_classes):
    """Deterministic He ('kaiming_normal_') init, zero biases, like the module
    with args['init_weight'] == 'he'.  Weights stored torch-style (out, in)."""
    dims = [
        (feature_num, feature_num * 2),       # fc1
        (feature_num * 2, feature_num * 2),   # fc2
        (feature_num * 2, feature_num),       # fc3
        (feature_num, n_classes),             # fc4
    ]
    names = ["fc1", "fc2", "fc3", "fc4"]
    params = {}
    for name, (fan_in, fan_out) in zip(names, dims):
        key, sub = jax.random.split(key)
        std = jnp.sqrt(2.0 / fan_in)          # kaiming_normal_ fan_in / relu gain
        w = std * jax.random.normal(sub, (fan_out, fan_in), dtype=jnp.float32)
        b = jnp.zeros((fan_out,), dtype=jnp.float32)
        params[name] = (w, b)
    return params


def reference_forward(x, prepped):
    """Pure-JAX reference with identical semantics (eval-mode dropout,
    bf16 matmul inputs, f32 accumulation)."""
    h = x.astype(jnp.bfloat16)
    for name in ("fc1", "fc2", "fc3"):
        w, b = prepped[name]
        h = jnp.maximum(jnp.dot(h, w, preferred_element_type=jnp.float32) + b, 0.0)
        h = h.astype(jnp.bfloat16)
    w, b = prepped["fc4"]
    return jnp.dot(h, w, preferred_element_type=jnp.float32) + b


if __name__ == "__main__":
    feature_num = 32
    n_classes = 4
    batch = 256

    key = jax.random.PRNGKey(0)
    key_x, key_p = jax.random.split(key)

    x = jax.random.normal(key_x, (batch, feature_num), dtype=jnp.float32)
    params = init_params(key_p, feature_num, n_classes)
    prepped = prepare_params(params)                 # one-time layout/dtype prep

    out = mlp4_forward(x, prepped, batch_tile=128)   # grid = (2,): both v7x TCs get work
    out = jax.block_until_ready(out)

    ref = reference_forward(x, prepped)
    assert out.shape == (batch, n_classes)
    assert out.dtype == jnp.float32
    assert jnp.allclose(out, ref, atol=2e-3, rtol=2e-3), "mismatch vs reference"

    print("KERNEL_OK")
</pallas_src>

<mosaic_0001>
module attributes {stable_mosaic.version = 11 : i64} {
  func.func @_mlp4_kernel(%arg0: i32, %arg1: memref<128x32xbf16, #tpu.memory_space<vmem>>, %arg2: memref<32x64xbf16, #tpu.memory_space<vmem>>, %arg3: memref<1x64xf32, #tpu.memory_space<vmem>>, %arg4: memref<64x64xbf16, #tpu.memory_space<vmem>>, %arg5: memref<1x64xf32, #tpu.memory_space<vmem>>, %arg6: memref<64x32xbf16, #tpu.memory_space<vmem>>, %arg7: memref<1x32xf32, #tpu.memory_space<vmem>>, %arg8: memref<32x4xbf16, #tpu.memory_space<vmem>>, %arg9: memref<1x4xf32, #tpu.memory_space<vmem>>, %arg10: memref<128x4xf32, #tpu.memory_space<vmem>>) attributes {dimension_semantics = [#tpu.dimension_semantics<parallel>], iteration_bounds = array<i64: 2>, scalar_prefetch = 0 : i64, scratch_operands = 0 : i64, tpu.core_type = #tpu.core_type<tc>, window_params = [{transform_indices = @transform_0, window_bounds = array<i64: 128, 32>}, {pipeline_mode = #tpu.pipeline_mode<synchronous>, transform_indices = @transform_1, window_bounds = array<i64: 32, 64>}, {pipeline_mode = #tpu.pipeline_mode<synchronous>, transform_indices = @transform_2, window_bounds = array<i64: 1, 64>}, {pipeline_mode = #tpu.pipeline_mode<synchronous>, transform_indices = @transform_3, window_bounds = array<i64: 64, 64>}, {pipeline_mode = #tpu.pipeline_mode<synchronous>, transform_indices = @transform_4, window_bounds = array<i64: 1, 64>}, {pipeline_mode = #tpu.pipeline_mode<synchronous>, transform_indices = @transform_5, window_bounds = array<i64: 64, 32>}, {pipeline_mode = #tpu.pipeline_mode<synchronous>, transform_indices = @transform_6, window_bounds = array<i64: 1, 32>}, {pipeline_mode = #tpu.pipeline_mode<synchronous>, transform_indices = @transform_7, window_bounds = array<i64: 32, 4>}, {pipeline_mode = #tpu.pipeline_mode<synchronous>, transform_indices = @transform_8, window_bounds = array<i64: 1, 4>}, {transform_indices = @transform_9, window_bounds = array<i64: 128, 4>}]} {
    %c0 = arith.constant 0 : index
    %c0_0 = arith.constant 0 : index
    %0 = vector.load %arg1[%c0, %c0_0] : memref<128x32xbf16, #tpu.memory_space<vmem>>, vector<128x32xbf16>
    %c0_1 = arith.constant 0 : index
    %c0_2 = arith.constant 0 : index
    %1 = vector.load %arg2[%c0_1, %c0_2] : memref<32x64xbf16, #tpu.memory_space<vmem>>, vector<32x64xbf16>
    %cst = arith.constant dense<0.000000e+00> : vector<128x64xf32>
    %2 = tpu.matmul %0, %1, %cst {dimension_numbers = #tpu.dot_dimension_numbers<[1], [0], [0], [1], [0, 0, 1, 1], [], []>} : vector<128x32xbf16>, vector<32x64xbf16>, vector<128x64xf32> -> vector<128x64xf32>
    %c0_3 = arith.constant 0 : index
    %c0_4 = arith.constant 0 : index
    %3 = vector.load %arg3[%c0_3, %c0_4] : memref<1x64xf32, #tpu.memory_space<vmem>>, vector<1x64xf32>
    %4 = vector.broadcast %3 : vector<1x64xf32> to vector<128x64xf32>
    %5 = arith.addf %2, %4 : vector<128x64xf32>
    %cst_5 = arith.constant 0.000000e+00 : f32
    %6 = vector.broadcast %cst_5 : f32 to vector<128x64xf32>
    %7 = arith.maximumf %5, %6 : vector<128x64xf32>
    %8 = arith.truncf %7 : vector<128x64xf32> to vector<128x64xbf16>
    %c0_6 = arith.constant 0 : index
    %c0_7 = arith.constant 0 : index
    %9 = vector.load %arg4[%c0_6, %c0_7] : memref<64x64xbf16, #tpu.memory_space<vmem>>, vector<64x64xbf16>
    %cst_8 = arith.constant dense<0.000000e+00> : vector<128x64xf32>
    %10 = tpu.matmul %8, %9, %cst_8 {dimension_numbers = #tpu.dot_dimension_numbers<[1], [0], [0], [1], [0, 0, 1, 1], [], []>} : vector<128x64xbf16>, vector<64x64xbf16>, vector<128x64xf32> -> vector<128x64xf32>
    %c0_9 = arith.constant 0 : index
    %c0_10 = arith.constant 0 : index
    %11 = vector.load %arg5[%c0_9, %c0_10] : memref<1x64xf32, #tpu.memory_space<vmem>>, vector<1x64xf32>
    %12 = vector.broadcast %11 : vector<1x64xf32> to vector<128x64xf32>
    %13 = arith.addf %10, %12 : vector<128x64xf32>
    %cst_11 = arith.constant 0.000000e+00 : f32
    %14 = vector.broadcast %cst_11 : f32 to vector<128x64xf32>
    %15 = arith.maximumf %13, %14 : vector<128x64xf32>
    %16 = arith.truncf %15 : vector<128x64xf32> to vector<128x64xbf16>
    %c0_12 = arith.constant 0 : index
    %c0_13 = arith.constant 0 : index
    %17 = vector.load %arg6[%c0_12, %c0_13] : memref<64x32xbf16, #tpu.memory_space<vmem>>, vector<64x32xbf16>
    %cst_14 = arith.constant dense<0.000000e+00> : vector<128x32xf32>
    %18 = tpu.matmul %16, %17, %cst_14 {dimension_numbers = #tpu.dot_dimension_numbers<[1], [0], [0], [1], [0, 0, 1, 1], [], []>} : vector<128x64xbf16>, vector<64x32xbf16>, vector<128x32xf32> -> vector<128x32xf32>
    %c0_15 = arith.constant 0 : index
    %c0_16 = arith.constant 0 : index
    %19 = vector.load %arg7[%c0_15, %c0_16] : memref<1x32xf32, #tpu.memory_space<vmem>>, vector<1x32xf32>
    %20 = vector.broadcast %19 : vector<1x32xf32> to vector<128x32xf32>
    %21 = arith.addf %18, %20 : vector<128x32xf32>
    %cst_17 = arith.constant 0.000000e+00 : f32
    %22 = vector.broadcast %cst_17 : f32 to vector<128x32xf32>
    %23 = arith.maximumf %21, %22 : vector<128x32xf32>
    %24 = arith.truncf %23 : vector<128x32xf32> to vector<128x32xbf16>
    %c0_18 = arith.constant 0 : index
    %c0_19 = arith.constant 0 : index
    %25 = vector.load %arg8[%c0_18, %c0_19] : memref<32x4xbf16, #tpu.memory_space<vmem>>, vector<32x4xbf16>
    %cst_20 = arith.constant dense<0.000000e+00> : vector<128x4xf32>
    %26 = tpu.matmul %24, %25, %cst_20 {dimension_numbers = #tpu.dot_dimension_numbers<[1], [0], [0], [1], [0, 0, 1, 1], [], []>} : vector<128x32xbf16>, vector<32x4xbf16>, vector<128x4xf32> -> vector<128x4xf32>
    %c0_21 = arith.constant 0 : index
    %c0_22 = arith.constant 0 : index
    %27 = vector.load %arg9[%c0_21, %c0_22] : memref<1x4xf32, #tpu.memory_space<vmem>>, vector<1x4xf32>
    %28 = vector.broadcast %27 : vector<1x4xf32> to vector<128x4xf32>
    %29 = arith.addf %26, %28 : vector<128x4xf32>
    %c0_23 = arith.constant 0 : index
    %c0_24 = arith.constant 0 : index
    %30 = vector.load %arg10[%c0_23, %c0_24] : memref<128x4xf32, #tpu.memory_space<vmem>>, vector<128x4xf32>
    tpu.vector_store %arg10[%c0_23, %c0_24], %29 {strides = array<i32>} : memref<128x4xf32, #tpu.memory_space<vmem>>, vector<128x4xf32>,
    return
  }
  func.func @transform_0(%arg0: i32) -> (i32, i32) {
    %c0_i32 = arith.constant 0 : i32
    %c0_i32_0 = arith.constant 0 : i32
    return %arg0, %c0_i32 : i32, i32
  }
  func.func @transform_1(%arg0: i32) -> (i32, i32) {
    %c0_i32 = arith.constant 0 : i32
    %c0_i32_0 = arith.constant 0 : i32
    %c0_i32_1 = arith.constant 0 : i32
    return %c0_i32, %c0_i32_0 : i32, i32
  }
  func.func @transform_2(%arg0: i32) -> (i32, i32) {
    %c0_i32 = arith.constant 0 : i32
    %c0_i32_0 = arith.constant 0 : i32
    %c0_i32_1 = arith.constant 0 : i32
    return %c0_i32, %c0_i32_0 : i32, i32
  }
  func.func @transform_3(%arg0: i32) -> (i32, i32) {
    %c0_i32 = arith.constant 0 : i32
    %c0_i32_0 = arith.constant 0 : i32
    %c0_i32_1 = arith.constant 0 : i32
    return %c0_i32, %c0_i32_0 : i32, i32
  }
  func.func @transform_4(%arg0: i32) -> (i32, i32) {
    %c0_i32 = arith.constant 0 : i32
    %c0_i32_0 = arith.constant 0 : i32
    %c0_i32_1 = arith.constant 0 : i32
    return %c0_i32, %c0_i32_0 : i32, i32
  }
  func.func @transform_5(%arg0: i32) -> (i32, i32) {
    %c0_i32 = arith.constant 0 : i32
    %c0_i32_0 = arith.constant 0 : i32
    %c0_i32_1 = arith.constant 0 : i32
    return %c0_i32, %c0_i32_0 : i32, i32
  }
  func.func @transform_6(%arg0: i32) -> (i32, i32) {
    %c0_i32 = arith.constant 0 : i32
    %c0_i32_0 = arith.constant 0 : i32
    %c0_i32_1 = arith.constant 0 : i32
    return %c0_i32, %c0_i32_0 : i32, i32
  }
  func.func @transform_7(%arg0: i32) -> (i32, i32) {
    %c0_i32 = arith.constant 0 : i32
    %c0_i32_0 = arith.constant 0 : i32
    %c0_i32_1 = arith.constant 0 : i32
    return %c0_i32, %c0_i32_0 : i32, i32
  }
  func.func @transform_8(%arg0: i32) -> (i32, i32) {
    %c0_i32 = arith.constant 0 : i32
    %c0_i32_0 = arith.constant 0 : i32
    %c0_i32_1 = arith.constant 0 : i32
    return %c0_i32, %c0_i32_0 : i32, i32
  }
  func.func @transform_9(%arg0: i32) -> (i32, i32) {
    %c0_i32 = arith.constant 0 : i32
    %c0_i32_0 = arith.constant 0 : i32
    return %arg0, %c0_i32 : i32, i32
  }
}

</mosaic_0001>

<bundles_post_ra>
// kernel: mlp4_forward.1
= control target key start
LH: loop header
LB: loop body
LE: loop exit
PB: predicated region body
PF: predicated region fallthrough
CT: control target
= control target key end

     0   :  { %s1157_s30 = smov 0   ;;  %s1310_s0 = inlined_call_operand.vmem [shape: bf16[256,32], index: 0, kind: input, shape index: {}]   ;;  %s1311_s1 = inlined_call_operand.vmem [shape: bf16[32,64], index: 1, kind: input, shape index: {}]   ;;  %s1312_s2 = inlined_call_operand.vmem [shape: f32[1,64], index: 2, kind: input, shape index: {}]   ;;  %s1313_s3 = inlined_call_operand.vmem [shape: bf16[64,64], index: 3, kind: input, shape index: {}]   ;;  %s1314_s4 = inlined_call_operand.vmem [shape: f32[1,64], index: 4, kind: input, shape index: {}]   ;;  %s1315_s5 = inlined_call_operand.vmem [shape: bf16[64,32], index: 5, kind: input, shape index: {}]   ;;  %s1316_s6 = inlined_call_operand.vmem [shape: f32[1,32], index: 6, kind: input, shape index: {}]   ;;  %s1317_s7 = inlined_call_operand.vmem [shape: bf16[32,4], index: 7, kind: input, shape index: {}]   ;;  %s1318_s8 = inlined_call_operand.vmem [shape: f32[1,4], index: 8, kind: input, shape index: {}]   ;;  %s1319_s9 = inlined_call_operand.vmem [shape: f32[256,4], index: 9, kind: output, shape index: {}]  }
   0x1 LB: > { %s944_s10 = sadd.s32 4294967295, %s1105_s30   ;;  %p948_p0 = scmp.ge.s32.totalorder %s1105_s30, 1  ;;  %s1105_s30 = sphi %s1157_s30, %s19_s30  }
   0x2   : > { %p288_p1 = scmp.lt.s32.totalorder %s1105_s30, 3 }
   0x4   : > { %p289_p2 = pnand %p948_p0, %p288_p1 }
   0x5   : > { %s949_s13 = sshll.u32 (!%p289_p2), %s944_s10, 4 }
   0x6   : > { %292 = sbr.rel (%p289_p2) target bundleno = 700 (0x2bc), region = 56  ;;  %p325_p3 = scmp.lt.s32.totalorder (!%p289_p2), %s949_s13, 31 }
   0xb   : > { %v1076_v0 = vld [vmem:[%s1311_s1 + $0x8] sm:$0xff]  ;;  %v1075_v1 = vld [vmem:[%s1311_s1] sm:$0xff]  ;;  %s1321_s13 = smov (!%p325_p3, %s949_s13), 31  ;;  %vm413_vm0 = vcmask 261120   ;;  %v1080_v8 = vld [vmem:[%s1313_s3 + $0x18] sm:$0xff]  ;;  %vm547_vm1 = vcmask 523264  }
   0xc   : > { %444 = vmatpush.bf16.msra.mxu0 %v1076_v0  ;;  %s950_s16 = sshll.u32 %s1321_s13, 2  ;;  %576 = vmatpush.bf16.msra.mxu1 %v1080_v8  ;;  %v1079_v10 = vld [vmem:[%s1313_s3 + $0x10] sm:$0xff]  ;;  %v1078_v11 = vld [vmem:[%s1313_s3 + $0x8] sm:$0xff]  ;;  %v1077_v12 = vld [vmem:[%s1313_s3] sm:$0xff]  ;;  %s952_s27 = sshll.u32 %s1321_s13, 3  ;;  %vm871_vm2 = vcmask 31744  }
   0xd   : > { %s328_s19 = scalar_lea.vmem %s1310_s0, %s950_s16  ;;  %v1200_v15 = vld [vmem:[%s1312_s2] ss:$0 sm:$0xff]  ;;  %v1084_v61 = vld [vmem:[%s1315_s5 + $0x18] sm:$0xff]  ;;  %s1273_s12 = scalar_lea.vmem %s1319_s9, %s952_s27 }
   0xe   : > { %v1067_v2 = vld [vmem:[%s328_s19] sm:$0xff]  ;;  %v1068_v3 = vld [vmem:[%s328_s19 + $0x8] sm:$0xff]  ;;  %v1069_v4 = vld [vmem:[%s328_s19 + $0x10] sm:$0xff]  ;;  %709 = vmatpush.bf16.msra.mxu2 %v1084_v61 }
   0xf   : > { %v1070_v5 = vld [vmem:[%s328_s19 + $0x18] sm:$0xff]  ;;  %v1071_v6 = vld [vmem:[%s328_s19 + $0x20] sm:$0xff]  ;;  %v1072_v7 = vld [vmem:[%s328_s19 + $0x28] sm:$0xff] }
  0x10   : > { %445 = vmatpush.bf16.msra.mxu0 %v1075_v1  ;;  %v1073_v9 = vld [vmem:[%s328_s19 + $0x30] sm:$0xff]  ;;  %577 = vmatpush.bf16.msra.mxu1 %v1079_v10  ;;  %v1074_v13 = vld [vmem:[%s328_s19 + $0x38] sm:$0xff] }
  0x11   : > { %v1083_v1 = vld [vmem:[%s1315_s5 + $0x10] sm:$0xff] }
  0x12   : > { %710 = vmatpush.bf16.msra.mxu2 %v1083_v1 }
  0x13   : > { %993 = vmatmul.msk.bf16.vlgmr.msra.gmra.mxu0 %vm413_vm0, %v1067_v2 }
  0x14   : > { %578 = vmatpush.bf16.msra.mxu1 %v1078_v11 }
  0x18   : > { %579 = vmatpush.bf16.msra.mxu1 %v1077_v12  ;;  %v1096_v12 = vld [vmem:[%s1314_s4] ss:$0 sm:$0xff] }
  0x23   : > { %994 = vmatmul.msk.bf16.gmra.mxu0 %vm413_vm0, %v1068_v3  ;;  %v1082_v3 = vld [vmem:[%s1315_s5 + $0x8] sm:$0xff] }
  0x24   : > { %711 = vmatpush.bf16.msra.mxu2 %v1082_v3 }
  0x33   : > { %995 = vmatmul.msk.bf16.gmra.mxu0 %vm413_vm0, %v1069_v4  ;;  %v1081_v4 = vld [vmem:[%s1315_s5] sm:$0xff] }
  0x34   : > { %712 = vmatpush.bf16.msra.mxu2 %v1081_v4  ;;  %v1085_v4 = vld [vmem:[%s1317_s7] sm:$0xff] }
  0x43   : > { %996 = vmatmul.msk.bf16.gmra.mxu0 %vm413_vm0, %v1070_v5 }
  0x53   : > { %997 = vmatmul.msk.bf16.gmra.mxu0 %vm413_vm0, %v1071_v6 }
  0x63   : > { %998 = vmatmul.msk.bf16.gmra.mxu0 %vm413_vm0, %v1072_v7 }
  0x73   : > { %999 = vmatmul.msk.bf16.gmra.mxu0 %vm413_vm0, %v1073_v9 }
  0x83   : > { %1000 = vmatmul.msk.bf16.gmra.mxu0 %vm413_vm0, %v1074_v13 }
  0x90   : > { %v447_v14 = vpop.f32.mrf.mxu0 }
  0x91   : > { %v448_v16 = vadd.f32 %v1200_v15, %v447_v14 }
  0x93   : > { %v487_v19 = vmax.f32 %v448_v16, 0.0 }
  0x98   : > { %v449_v17 = vpop.f32.mrf.mxu0 }
  0x99   : > { %v450_v18 = vadd.f32 %v1200_v15, %v449_v17 }
  0x9b   : > { %v488_v20 = vmax.f32 %v450_v18, 0.0 }
  0x9d   : > { %v503_v21 = vpack.c.bf16 %v488_v20, %v487_v19 }
  0x9f   : > { %1017 = vmatmul.msk.bf16.vlgmr.msra.gmra.mxu1 %vm547_vm1, %v503_v21 }
  0xa0   : > { %v452_v22 = vpop.f32.mrf.mxu0 }
  0xa1   : > { %v453_v23 = vadd.f32 %v1200_v15, %v452_v22 }
  0xa3   : > { %v489_v26 = vmax.f32 %v453_v23, 0.0 }
  0xa8   : > { %v454_v24 = vpop.f32.mrf.mxu0 }
  0xa9   : > { %v455_v25 = vadd.f32 %v1200_v15, %v454_v24 }
  0xab   : > { %v490_v27 = vmax.f32 %v455_v25, 0.0 }
  0xad   : > { %v504_v28 = vpack.c.bf16 %v490_v27, %v489_v26 }
  0xaf   : > { %1018 = vmatmul.msk.bf16.gmra.mxu1 %vm547_vm1, %v504_v28 }
  0xb0   : > { %v457_v29 = vpop.f32.mrf.mxu0 }
  0xb1   : > { %v458_v30 = vadd.f32 %v1200_v15, %v457_v29 }
  0xb3   : > { %v491_v33 = vmax.f32 %v458_v30, 0.0 }
  0xb8   : > { %v459_v31 = vpop.f32.mrf.mxu0 }
  0xb9   : > { %v460_v32 = vadd.f32 %v1200_v15, %v459_v31 }
  0xbb   : > { %v492_v34 = vmax.f32 %v460_v32, 0.0 }
  0xbd   : > { %v505_v35 = vpack.c.bf16 %v492_v34, %v491_v33 }
  0xbf   : > { %1019 = vmatmul.msk.bf16.gmra.mxu1 %vm547_vm1, %v505_v35 }
  0xc0   : > { %v462_v36 = vpop.f32.mrf.mxu0 }
  0xc1   : > { %v463_v37 = vadd.f32 %v1200_v15, %v462_v36 }
  0xc3   : > { %v493_v40 = vmax.f32 %v463_v37, 0.0 }
  0xc8   : > { %v464_v38 = vpop.f32.mrf.mxu0 }
  0xc9   : > { %v465_v39 = vadd.f32 %v1200_v15, %v464_v38 }
  0xcb   : > { %v494_v41 = vmax.f32 %v465_v39, 0.0 }
  0xcd   : > { %v506_v42 = vpack.c.bf16 %v494_v41, %v493_v40 }
  0xcf   : > { %1020 = vmatmul.msk.bf16.gmra.mxu1 %vm547_vm1, %v506_v42 }
  0xd0   : > { %v467_v43 = vpop.f32.mrf.mxu0 }
  0xd1   : > { %v468_v44 = vadd.f32 %v1200_v15, %v467_v43 }
  0xd3   : > { %v495_v47 = vmax.f32 %v468_v44, 0.0 }
  0xd8   : > { %v469_v45 = vpop.f32.mrf.mxu0 }
  0xd9   : > { %v470_v46 = vadd.f32 %v1200_v15, %v469_v45 }
  0xdb   : > { %v496_v48 = vmax.f32 %v470_v46, 0.0 }
  0xdd   : > { %v507_v49 = vpack.c.bf16 %v496_v48, %v495_v47 }
  0xdf   : > { %1021 = vmatmul.msk.bf16.gmra.mxu1 %vm547_vm1, %v507_v49 }
  0xe0   : > { %v472_v50 = vpop.f32.mrf.mxu0 }
  0xe1   : > { %v473_v51 = vadd.f32 %v1200_v15, %v472_v50 }
  0xe3   : > { %v497_v54 = vmax.f32 %v473_v51, 0.0 }
  0xe8   : > { %v474_v52 = vpop.f32.mrf.mxu0 }
  0xe9   : > { %v475_v53 = vadd.f32 %v1200_v15, %v474_v52 }
  0xeb   : > { %v498_v55 = vmax.f32 %v475_v53, 0.0 }
  0xed   : > { %v508_v56 = vpack.c.bf16 %v498_v55, %v497_v54 }
  0xef   : > { %1022 = vmatmul.msk.bf16.gmra.mxu1 %vm547_vm1, %v508_v56 }
  0xf0   : > { %v477_v57 = vpop.f32.mrf.mxu0 }
  0xf1   : > { %v478_v58 = vadd.f32 %v1200_v15, %v477_v57 }
  0xf3   : > { %v499_v62 = vmax.f32 %v478_v58, 0.0 }
  0xf8   : > { %v479_v59 = vpop.f32.mrf.mxu0 }
  0xf9   : > { %v480_v60 = vadd.f32 %v1200_v15, %v479_v59 }
  0xfb   : > { %v500_v63 = vmax.f32 %v480_v60, 0.0 }
  0xfd   : > { %v509_v0 = vpack.c.bf16 %v500_v63, %v499_v62 }
  0xff   : > { %1023 = vmatmul.msk.bf16.gmra.mxu1 %vm547_vm1, %v509_v0  ;;  %v1086_v0 = vld [vmem:[%s1317_s7 + $0x8] sm:$0xff] }
 0x100   : > { %v482_v2 = vpop.f32.mrf.mxu0  ;;  %828 = vmatpush.bf16.msra.mxu3 %v1086_v0 }
 0x101   : > { %v483_v5 = vadd.f32 %v1200_v15, %v482_v2 }
 0x103   : > { %v501_v8 = vmax.f32 %v483_v5, 0.0 }
 0x104   : > { %829 = vmatpush.bf16.msra.mxu3 %v1085_v4 }
 0x108   : > { %v484_v6 = vpop.f32.mrf.mxu0 }
 0x109   : > { %v485_v7 = vadd.f32 %v1200_v15, %v484_v6 }
 0x10b   : > { %v502_v9 = vmax.f32 %v485_v7, 0.0  ;;  %v1097_v7 = vld [vmem:[%s1316_s6] ss:$0 sm:$0xff] }
 0x10d   : > { %v510_v10 = vpack.c.bf16 %v502_v9, %v501_v8 }
 0x10f   : > { %1024 = vmatmul.msk.bf16.gmra.mxu1 %vm547_vm1, %v510_v10 }
 0x11c   : > { %v581_v11 = vpop.f32.mrf.mxu1 }
 0x11d   : > { %v582_v13 = vadd.f32 %v1096_v12, %v581_v11 }
 0x11f   : > { %v621_v17 = vmax.f32 %v582_v13, 0.0 }
 0x124   : > { %v583_v14 = vpop.f32.mrf.mxu1 }
 0x125   : > { %v584_v16 = vadd.f32 %v1096_v12, %v583_v14 }
 0x127   : > { %v622_v18 = vmax.f32 %v584_v16, 0.0 }
 0x129   : > { %v637_v19 = vpack.c.bf16 %v622_v18, %v621_v17 }
 0x12b   : > { %1041 = vmatmul.msk.bf16.vlgmr.msra.gmra.mxu2 %vm547_vm1, %v637_v19 }
 0x12c   : > { %v586_v20 = vpop.f32.mrf.mxu1 }
 0x12d   : > { %v587_v15 = vadd.f32 %v1096_v12, %v586_v20 }
 0x12f   : > { %v623_v23 = vmax.f32 %v587_v15, 0.0 }
 0x134   : > { %v588_v21 = vpop.f32.mrf.mxu1 }
 0x135   : > { %v589_v22 = vadd.f32 %v1096_v12, %v588_v21 }
 0x137   : > { %v624_v24 = vmax.f32 %v589_v22, 0.0 }
 0x139   : > { %v638_v25 = vpack.c.bf16 %v624_v24, %v623_v23 }
 0x13b   : > { %1042 = vmatmul.msk.bf16.gmra.mxu2 %vm547_vm1, %v638_v25 }
 0x13c   : > { %v591_v26 = vpop.f32.mrf.mxu1 }
 0x13d   : > { %v592_v27 = vadd.f32 %v1096_v12, %v591_v26 }
 0x13f   : > { %v625_v30 = vmax.f32 %v592_v27, 0.0 }
 0x144   : > { %v593_v28 = vpop.f32.mrf.mxu1 }
 0x145   : > { %v594_v29 = vadd.f32 %v1096_v12, %v593_v28 }
 0x147   : > { %v626_v31 = vmax.f32 %v594_v29, 0.0 }
 0x149   : > { %v639_v32 = vpack.c.bf16 %v626_v31, %v625_v30 }
 0x14b   : > { %1043 = vmatmul.msk.bf16.gmra.mxu2 %vm547_vm1, %v639_v32 }
 0x14c   : > { %v596_v33 = vpop.f32.mrf.mxu1 }
 0x14d   : > { %v597_v34 = vadd.f32 %v1096_v12, %v596_v33 }
 0x14f   : > { %v627_v37 = vmax.f32 %v597_v34, 0.0 }
 0x154   : > { %v598_v35 = vpop.f32.mrf.mxu1 }
 0x155   : > { %v599_v36 = vadd.f32 %v1096_v12, %v598_v35 }
 0x157   : > { %v628_v38 = vmax.f32 %v599_v36, 0.0 }
 0x159   : > { %v640_v39 = vpack.c.bf16 %v628_v38, %v627_v37 }
 0x15b   : > { %1044 = vmatmul.msk.bf16.gmra.mxu2 %vm547_vm1, %v640_v39 }
 0x15c   : > { %v601_v40 = vpop.f32.mrf.mxu1 }
 0x15d   : > { %v602_v41 = vadd.f32 %v1096_v12, %v601_v40 }
 0x15f   : > { %v629_v44 = vmax.f32 %v602_v41, 0.0 }
 0x164   : > { %v603_v42 = vpop.f32.mrf.mxu1 }
 0x165   : > { %v604_v43 = vadd.f32 %v1096_v12, %v603_v42 }
 0x167   : > { %v630_v45 = vmax.f32 %v604_v43, 0.0 }
 0x169   : > { %v641_v46 = vpack.c.bf16 %v630_v45, %v629_v44 }
 0x16b   : > { %1045 = vmatmul.msk.bf16.gmra.mxu2 %vm547_vm1, %v641_v46 }
 0x16c   : > { %v606_v47 = vpop.f32.mrf.mxu1 }
 0x16d   : > { %v607_v48 = vadd.f32 %v1096_v12, %v606_v47 }
 0x16f   : > { %v631_v51 = vmax.f32 %v607_v48, 0.0 }
 0x174   : > { %v608_v49 = vpop.f32.mrf.mxu1 }
 0x175   : > { %v609_v50 = vadd.f32 %v1096_v12, %v608_v49 }
 0x177   : > { %v632_v52 = vmax.f32 %v609_v50, 0.0 }
 0x179   : > { %v642_v53 = vpack.c.bf16 %v632_v52, %v631_v51 }
 0x17b   : > { %1046 = vmatmul.msk.bf16.gmra.mxu2 %vm547_vm1, %v642_v53 }
 0x17c   : > { %v611_v54 = vpop.f32.mrf.mxu1 }
 0x17d   : > { %v612_v55 = vadd.f32 %v1096_v12, %v611_v54 }
 0x17f   : > { %v633_v58 = vmax.f32 %v612_v55, 0.0 }
 0x184   : > { %v613_v56 = vpop.f32.mrf.mxu1 }
 0x185   : > { %v614_v57 = vadd.f32 %v1096_v12, %v613_v56 }
 0x187   : > { %v634_v59 = vmax.f32 %v614_v57, 0.0 }
 0x189   : > { %v643_v60 = vpack.c.bf16 %v634_v59, %v633_v58 }
 0x18b   : > { %1047 = vmatmul.msk.bf16.gmra.mxu2 %vm547_vm1, %v643_v60 }
 0x18c   : > { %v616_v61 = vpop.f32.mrf.mxu1 }
 0x18d   : > { %v617_v62 = vadd.f32 %v1096_v12, %v616_v61 }
 0x18f   : > { %v635_v2 = vmax.f32 %v617_v62, 0.0 }
 0x194   : > { %v618_v63 = vpop.f32.mrf.mxu1 }
 0x195   : > { %v619_v1 = vadd.f32 %v1096_v12, %v618_v63  ;;  %v1098_v63 = vld [vmem:[%s1318_s8] ss:$0 sm:$0xff] }
 0x197   : > { %v636_v3 = vmax.f32 %v619_v1, 0.0 }
 0x199   : > { %v644_v5 = vpack.c.bf16 %v636_v3, %v635_v2 }
 0x19b   : > { %1048 = vmatmul.msk.bf16.gmra.mxu2 %vm547_vm1, %v644_v5 }
 0x1ae   : > { %v714_v6 = vpop.f32.mrf.mxu2 }
 0x1af   : > { %v715_v8 = vadd.f32 %v1097_v7, %v714_v6 }
 0x1b1   : > { %v754_v11 = vmax.f32 %v715_v8, 0.0 }
 0x1b6   : > { %v716_v9 = vpop.f32.mrf.mxu2 }
 0x1b7   : > { %v717_v10 = vadd.f32 %v1097_v7, %v716_v9 }
 0x1b9   : > { %v755_v12 = vmax.f32 %v717_v10, 0.0 }
 0x1bb   : > { %v770_v13 = vpack.c.bf16 %v755_v12, %v754_v11 }
 0x1bd   : > { %1057 = vmatmul.msk.bf16.vlgmr.msra.gmra.mxu3 %vm413_vm0, %v770_v13 }
 0x1be   : > { %v719_v14 = vpop.f32.mrf.mxu2 }
 0x1bf   : > { %v720_v16 = vadd.f32 %v1097_v7, %v719_v14 }
 0x1c1   : > { %v756_v19 = vmax.f32 %v720_v16, 0.0 }
 0x1c6   : > { %v721_v17 = vpop.f32.mrf.mxu2 }
 0x1c7   : > { %v722_v18 = vadd.f32 %v1097_v7, %v721_v17 }
 0x1c9   : > { %v757_v20 = vmax.f32 %v722_v18, 0.0 }
 0x1cb   : > { %v771_v15 = vpack.c.bf16 %v757_v20, %v756_v19 }
 0x1cd   : > { %1058 = vmatmul.msk.bf16.gmra.mxu3 %vm413_vm0, %v771_v15 }
 0x1ce   : > { %v724_v21 = vpop.f32.mrf.mxu2 }
 0x1cf   : > { %v725_v22 = vadd.f32 %v1097_v7, %v724_v21 }
 0x1d1   : > { %v758_v25 = vmax.f32 %v725_v22, 0.0 }
 0x1d6   : > { %v726_v23 = vpop.f32.mrf.mxu2 }
 0x1d7   : > { %v727_v24 = vadd.f32 %v1097_v7, %v726_v23 }
 0x1d9   : > { %v759_v26 = vmax.f32 %v727_v24, 0.0 }
 0x1db   : > { %v772_v27 = vpack.c.bf16 %v759_v26, %v758_v25 }
 0x1dd   : > { %1059 = vmatmul.msk.bf16.gmra.mxu3 %vm413_vm0, %v772_v27 }
 0x1de   : > { %v729_v28 = vpop.f32.mrf.mxu2 }
 0x1df   : > { %v730_v29 = vadd.f32 %v1097_v7, %v729_v28 }
 0x1e1   : > { %v760_v32 = vmax.f32 %v730_v29, 0.0 }
 0x1e6   : > { %v731_v30 = vpop.f32.mrf.mxu2 }
 0x1e7   : > { %v732_v31 = vadd.f32 %v1097_v7, %v731_v30 }
 0x1e9   : > { %v761_v33 = vmax.f32 %v732_v31, 0.0 }
 0x1eb   : > { %v773_v34 = vpack.c.bf16 %v761_v33, %v760_v32 }
 0x1ed   : > { %1060 = vmatmul.msk.bf16.gmra.mxu3 %vm413_vm0, %v773_v34 }
 0x1ee   : > { %v734_v35 = vpop.f32.mrf.mxu2 }
 0x1ef   : > { %v735_v36 = vadd.f32 %v1097_v7, %v734_v35 }
 0x1f1   : > { %v762_v39 = vmax.f32 %v735_v36, 0.0 }
 0x1f6   : > { %v736_v37 = vpop.f32.mrf.mxu2 }
 0x1f7   : > { %v737_v38 = vadd.f32 %v1097_v7, %v736_v37 }
 0x1f9   : > { %v763_v40 = vmax.f32 %v737_v38, 0.0 }
 0x1fb   : > { %v774_v41 = vpack.c.bf16 %v763_v40, %v762_v39 }
 0x1fd   : > { %1061 = vmatmul.msk.bf16.gmra.mxu3 %vm413_vm0, %v774_v41 }
 0x1fe   : > { %v739_v42 = vpop.f32.mrf.mxu2 }
 0x1ff   : > { %v740_v43 = vadd.f32 %v1097_v7, %v739_v42 }
 0x201   : > { %v764_v46 = vmax.f32 %v740_v43, 0.0 }
 0x206   : > { %v741_v44 = vpop.f32.mrf.mxu2 }
 0x207   : > { %v742_v45 = vadd.f32 %v1097_v7, %v741_v44 }
 0x209   : > { %v765_v47 = vmax.f32 %v742_v45, 0.0 }
 0x20b   : > { %v775_v48 = vpack.c.bf16 %v765_v47, %v764_v46 }
 0x20d   : > { %1062 = vmatmul.msk.bf16.gmra.mxu3 %vm413_vm0, %v775_v48 }
 0x20e   : > { %v744_v49 = vpop.f32.mrf.mxu2 }
 0x20f   : > { %v745_v50 = vadd.f32 %v1097_v7, %v744_v49 }
 0x211   : > { %v766_v53 = vmax.f32 %v745_v50, 0.0 }
 0x216   : > { %v746_v51 = vpop.f32.mrf.mxu2 }
 0x217   : > { %v747_v52 = vadd.f32 %v1097_v7, %v746_v51 }
 0x219   : > { %v767_v54 = vmax.f32 %v747_v52, 0.0 }
 0x21b   : > { %v776_v55 = vpack.c.bf16 %v767_v54, %v766_v53 }
 0x21d   : > { %1063 = vmatmul.msk.bf16.gmra.mxu3 %vm413_vm0, %v776_v55 }
 0x21e   : > { %v749_v56 = vpop.f32.mrf.mxu2 }
 0x21f   : > { %v750_v57 = vadd.f32 %v1097_v7, %v749_v56 }
 0x221   : > { %v768_v60 = vmax.f32 %v750_v57, 0.0 }
 0x226   : > { %v751_v58 = vpop.f32.mrf.mxu2 }
 0x227   : > { %v752_v59 = vadd.f32 %v1097_v7, %v751_v58 }
 0x229   : > { %v769_v61 = vmax.f32 %v752_v59, 0.0 }
 0x22b   : > { %v777_v62 = vpack.c.bf16 %v769_v61, %v768_v60 }
 0x22d   : > { %1064 = vmatmul.msk.bf16.gmra.mxu3 %vm413_vm0, %v777_v62 }
 0x240   : > { %v831_v0 = vpop.f32.mrf.mxu3 }
 0x241   : > { %v832_v1 = vadd.f32 %v1098_v63, %v831_v0 }
 0x243   : > { %872 = vst.msk [vmem:[%s1273_s12] sm:$0xff] %vm871_vm2, %v832_v1 }
 0x248   : > { %v833_v2 = vpop.f32.mrf.mxu3 }
 0x249   : > { %v834_v3 = vadd.f32 %v1098_v63, %v833_v2 }
 0x24b   : > { %873 = vst.msk [vmem:[%s1273_s12 + $0x8] sm:$0xff] %vm871_vm2, %v834_v3 }
 0x250   : > { %v836_v4 = vpop.f32.mrf.mxu3 }
 0x251   : > { %v837_v5 = vadd.f32 %v1098_v63, %v836_v4 }
 0x253   : > { %874 = vst.msk [vmem:[%s1273_s12 + $0x10] sm:$0xff] %vm871_vm2, %v837_v5 }
 0x258   : > { %v838_v6 = vpop.f32.mrf.mxu3 }
 0x259   : > { %v839_v7 = vadd.f32 %v1098_v63, %v838_v6 }
 0x25b   : > { %875 = vst.msk [vmem:[%s1273_s12 + $0x18] sm:$0xff] %vm871_vm2, %v839_v7 }
 0x260   : > { %v841_v8 = vpop.f32.mrf.mxu3 }
 0x261   : > { %v842_v9 = vadd.f32 %v1098_v63, %v841_v8 }
 0x263   : > { %876 = vst.msk [vmem:[%s1273_s12 + $0x20] sm:$0xff] %vm871_vm2, %v842_v9 }
 0x268   : > { %v843_v10 = vpop.f32.mrf.mxu3 }
 0x269   : > { %v844_v11 = vadd.f32 %v1098_v63, %v843_v10 }
 0x26b   : > { %877 = vst.msk [vmem:[%s1273_s12 + $0x28] sm:$0xff] %vm871_vm2, %v844_v11 }
 0x270   : > { %v846_v12 = vpop.f32.mrf.mxu3 }
 0x271   : > { %v847_v13 = vadd.f32 %v1098_v63, %v846_v12 }
 0x273   : > { %878 = vst.msk [vmem:[%s1273_s12 + $0x30] sm:$0xff] %vm871_vm2, %v847_v13 }
 0x278   : > { %v848_v14 = vpop.f32.mrf.mxu3 }
 0x279   : > { %v849_v16 = vadd.f32 %v1098_v63, %v848_v14 }
 0x27b   : > { %879 = vst.msk [vmem:[%s1273_s12 + $0x38] sm:$0xff] %vm871_vm2, %v849_v16 }
 0x280   : > { %v851_v17 = vpop.f32.mrf.mxu3 }
 0x281   : > { %v852_v18 = vadd.f32 %v1098_v63, %v851_v17 }
 0x283   : > { %880 = vst.msk [vmem:[%s1273_s12 + $0x40] sm:$0xff] %vm871_vm2, %v852_v18 }
 0x288   : > { %v853_v19 = vpop.f32.mrf.mxu3 }
 0x289   : > { %v854_v20 = vadd.f32 %v1098_v63, %v853_v19 }
 0x28b   : > { %881 = vst.msk [vmem:[%s1273_s12 + $0x48] sm:$0xff] %vm871_vm2, %v854_v20 }
 0x290   : > { %v856_v15 = vpop.f32.mrf.mxu3 }
 0x291   : > { %v857_v21 = vadd.f32 %v1098_v63, %v856_v15 }
 0x293   : > { %882 = vst.msk [vmem:[%s1273_s12 + $0x50] sm:$0xff] %vm871_vm2, %v857_v21 }
 0x298   : > { %v858_v22 = vpop.f32.mrf.mxu3 }
 0x299   : > { %v859_v23 = vadd.f32 %v1098_v63, %v858_v22 }
 0x29b   : > { %883 = vst.msk [vmem:[%s1273_s12 + $0x58] sm:$0xff] %vm871_vm2, %v859_v23 }
 0x2a0   : > { %v861_v24 = vpop.f32.mrf.mxu3 }
 0x2a1   : > { %v862_v25 = vadd.f32 %v1098_v63, %v861_v24 }
 0x2a3   : > { %884 = vst.msk [vmem:[%s1273_s12 + $0x60] sm:$0xff] %vm871_vm2, %v862_v25 }
 0x2a8   : > { %v863_v26 = vpop.f32.mrf.mxu3 }
 0x2a9   : > { %v864_v27 = vadd.f32 %v1098_v63, %v863_v26 }
 0x2ab   : > { %885 = vst.msk [vmem:[%s1273_s12 + $0x68] sm:$0xff] %vm871_vm2, %v864_v27 }
 0x2b0   : > { %v866_v28 = vpop.f32.mrf.mxu3 }
 0x2b1   : > { %v867_v29 = vadd.f32 %v1098_v63, %v866_v28 }
 0x2b3   : > { %886 = vst.msk [vmem:[%s1273_s12 + $0x70] sm:$0xff] %vm871_vm2, %v867_v29 }
 0x2b8   : > { %v868_v30 = vpop.f32.mrf.mxu3 }
 0x2b9   : > { %v869_v31 = vadd.f32 %v1098_v63, %v868_v30 }
 0x2bb   : > { %887 = vst.msk [vmem:[%s1273_s12 + $0x78] sm:$0xff] %vm871_vm2, %v869_v31 }
 0x2bc PF: > { %s19_s30 = sadd.s32 1, %s1105_s30  }
 0x2bd   : > { %p16_p4 = scmp.ge.s32.totalorder %s19_s30, 4  }
 0x2bf   :  { %18 = sbr.rel (!%p16_p4) target bundleno = 1 (0x1), region = 86 }

</bundles_post_ra>
